<compile_context>
chip_gen: v7x
topology: tpu7x:2x2x1
jax: 0.10.0
libtpu: 0.0.40
codegen_flags: <defaults>
</compile_context>

<pallas_src>
import functools

import jax
import jax.numpy as jnp
from jax.experimental import pallas as pl
from jax.experimental.pallas import tpu as pltpu


def _recall_ce_kernel(x_ref, t_ref, acc_ref, *, hw, n_classes, tile_p):
    i = pl.program_id(1)

    # Zero the resident per-image accumulator at the start of its pixel loop.
    @pl.when(i == 0)
    def _():
        acc_ref[...] = jnp.zeros_like(acc_ref)

    x = x_ref[...].astype(jnp.float32)   # (C, TP) logits, upcast in-register
    t = t_ref[...]                       # (1, TP) int32 targets

    need_mask = (hw % tile_p) != 0
    if need_mask:
        # Ragged last tile: lanes past the image end hold garbage.  Remap
        # their label to the sentinel class (empty one-hot row) and zero
        # their CE so they contribute nothing to any accumulator.
        lane = jax.lax.broadcasted_iota(jnp.int32, t.shape, 1)            # (1, TP)
        valid = (i * tile_p + lane) < hw                                  # (1, TP)
        t = jnp.where(valid, t, n_classes)

    # log-softmax pieces (numerically stable).
    m = jnp.max(x, axis=0, keepdims=True)                                 # (1, TP)
    lse = jnp.log(jnp.sum(jnp.exp(x - m), axis=0, keepdims=True)) + m     # (1, TP)

    # One-hot of the target along the class (sublane) axis.  ignore_index /
    # sentinel labels (>= C) match no row and are inert.
    cidx = jax.lax.broadcasted_iota(jnp.int32, x.shape, 0)                # (C, TP)
    onehot = (cidx == t).astype(jnp.float32)                              # (C, TP)

    logit_t = jnp.sum(onehot * x, axis=0, keepdims=True)                  # (1, TP)
    ce = lse - logit_t                                                    # (1, TP) = -log p[target]
    # pred != target  <=>  target logit strictly below the max.
    mismatch = (logit_t < m).astype(jnp.float32)                          # (1, TP)
    if need_mask:
        ce = jnp.where(valid, ce, 0.0)

    # Lane-axis reductions leave the class axis on sublanes; keep it there.
    gt = jnp.sum(onehot, axis=1, keepdims=True)                           # (C, 1)
    fn = jnp.sum(onehot * mismatch, axis=1, keepdims=True)                # (C, 1)
    cs = jnp.sum(onehot * ce, axis=1, keepdims=True)                      # (C, 1)
    acc_ref[...] += jnp.concatenate([gt, fn, cs], axis=1)                 # (C, 3)


def _pick_tile_p(hw, n_classes, logit_bytes, vmem_budget=8 * 1024 * 1024):
    """Largest pixel tile whose double-buffered inputs stay under the budget."""
    per_col = 2 * (n_classes * logit_bytes + 4)   # 2 buffers x (logits + target)
    if hw * per_col <= vmem_budget and hw <= 8192:
        return hw                                 # one tile per image
    tp = min(vmem_budget // per_col, 8192)
    tp = (tp // 128) * 128
    return max(int(tp), 128)


@functools.partial(jax.jit, static_argnames=("n_classes", "ignore_index", "tile_p"))
def recall_cross_entropy(logits_nchw, target_nhw, *, n_classes, ignore_index=255,
                         tile_p=None):
    N, C, H, W = logits_nchw.shape
    assert C == n_classes
    HW = H * W
    P = N * HW

    logit_bytes = jnp.dtype(logits_nchw.dtype).itemsize
    if tile_p is None:
        tile_p = _pick_tile_p(HW, C, logit_bytes)
    num_tiles = pl.cdiv(HW, tile_p)

    # Free reshapes only: no transpose, no pad, no dtype upcast in HBM.
    x = logits_nchw.reshape(N, C, HW)
    t = target_nhw.reshape(N, 1, HW).astype(jnp.int32)

    kernel = functools.partial(_recall_ce_kernel, hw=HW, n_classes=n_classes,
                               tile_p=tile_p)

    acc = pl.pallas_call(
        kernel,
        out_shape=jax.ShapeDtypeStruct((N, C, 3), jnp.float32),
        grid_spec=pltpu.PrefetchScalarGridSpec(
            num_scalar_prefetch=0,
            grid=(N, num_tiles),
            in_specs=[
                pl.BlockSpec((None, C, tile_p), lambda n, i: (n, 0, i)),
                pl.BlockSpec((None, 1, tile_p), lambda n, i: (n, 0, i)),
            ],
            out_specs=pl.BlockSpec((None, C, 3), lambda n, i: (n, 0, 0)),
        ),
        compiler_params=pltpu.CompilerParams(
            dimension_semantics=("parallel", "arbitrary")),
        cost_estimate=pl.CostEstimate(
            flops=int(8 * C * P),
            transcendentals=int(C * P),
            bytes_accessed=int(C * P * logit_bytes + P * 4 + N * C * 3 * 4),
        ),
    )(x, t)

    totals = jnp.sum(acc, axis=0)             # (C, 3): per-class gt / fn / CE-sum
    gt_count, fn_count, ce_sum = totals[:, 0], totals[:, 1], totals[:, 2]
    # Classes absent from the target / from the false-negative set keep count 1
    # (matches torch.ones + scatter of torch.unique counts).
    gt_counter = jnp.where(gt_count > 0, gt_count, 1.0)
    fn_counter = jnp.where(fn_count > 0, fn_count, 1.0)
    weight = fn_counter / gt_counter
    # TODO(synk): the PyTorch ignore_index=255 remapping hack
    # (gt_count[1].clone() / fn_count[0].clone() onto class 1) relies on
    # torch.unique ordering and is not replicated; here ignore_index pixels
    # simply contribute 0 CE and are excluded from all class counts.
    return jnp.sum(weight * ce_sum) / P       # mean over ALL pixels, like .mean()


def recall_cross_entropy_ref(logits_nchw, target_nhw, *, n_classes, ignore_index=255):
    """Pure-JAX reference mirroring the PyTorch forward (no ignore pixels present)."""
    N, C, H, W = logits_nchw.shape
    x = jnp.transpose(logits_nchw, (0, 2, 3, 1)).reshape(-1, C).astype(jnp.float32)
    t = target_nhw.reshape(-1).astype(jnp.int32)
    pred = jnp.argmax(x, axis=1)
    mismatch = pred != t
    gt_count = jnp.stack([jnp.sum(t == c) for c in range(n_classes)]).astype(jnp.float32)
    fn_count = jnp.stack([jnp.sum((t == c) & mismatch) for c in range(n_classes)]).astype(jnp.float32)
    gt_counter = jnp.where(gt_count > 0, gt_count, 1.0)
    fn_counter = jnp.where(fn_count > 0, fn_count, 1.0)
    weight = fn_counter / gt_counter
    logp = jax.nn.log_softmax(x, axis=1)
    ce = -jnp.take_along_axis(logp, t[:, None], axis=1)[:, 0]
    ce = jnp.where(t == ignore_index, 0.0, ce)
    return jnp.mean(weight[t] * ce)


if __name__ == "__main__":
    key = jax.random.PRNGKey(0)
    k_logits, k_target = jax.random.split(key)

    # Test 1: batch=2, n_classes=4, spatial=16x16 (single tile per image).
    N, C, H, W = 2, 4, 16, 16
    logits = jax.random.normal(k_logits, (N, C, H, W), dtype=jnp.float32)
    target = jax.random.randint(k_target, (N, H, W), 0, C, dtype=jnp.int32)

    loss = recall_cross_entropy(logits, target, n_classes=C)
    loss = jax.block_until_ready(loss)
    ref = recall_cross_entropy_ref(logits, target, n_classes=C)
    assert jnp.allclose(loss, ref, rtol=1e-5, atol=1e-5), (float(loss), float(ref))

    # Test 2: ragged pixel tiles (HW=400, tile_p=128) exercising the in-kernel
    # tail masking and the multi-tile reduction path.
    N2, H2, W2 = 2, 20, 20
    logits2 = jax.random.normal(k_logits, (N2, C, H2, W2), dtype=jnp.float32)
    target2 = jax.random.randint(k_target, (N2, H2, W2), 0, C, dtype=jnp.int32)

    loss2 = recall_cross_entropy(logits2, target2, n_classes=C, tile_p=128)
    loss2 = jax.block_until_ready(loss2)
    ref2 = recall_cross_entropy_ref(logits2, target2, n_classes=C)
    assert jnp.allclose(loss2, ref2, rtol=1e-5, atol=1e-5), (float(loss2), float(ref2))

    print("KERNEL_OK")
</pallas_src>

<mosaic_0001>
module attributes {stable_mosaic.version = 11 : i64} {
  func.func @_recall_ce_kernel(%arg0: i32, %arg1: i32, %arg2: memref<1x4x256xf32, #tpu.memory_space<vmem>>, %arg3: memref<1x1x256xi32, #tpu.memory_space<vmem>>, %arg4: memref<1x4x3xf32, #tpu.memory_space<vmem>>) attributes {dimension_semantics = [#tpu.dimension_semantics<parallel>, #tpu.dimension_semantics<arbitrary>], iteration_bounds = array<i64: 2, 1>, scalar_prefetch = 0 : i64, scratch_operands = 0 : i64, tpu.core_type = #tpu.core_type<tc>, window_params = [{transform_indices = @transform_0, window_bounds = array<i64: 1, 4, 256>}, {transform_indices = @transform_1, window_bounds = array<i64: 1, 1, 256>}, {transform_indices = @transform_2, window_bounds = array<i64: 1, 4, 3>}]} {
    %c0_i32 = arith.constant 0 : i32
    %0 = arith.cmpi eq, %arg1, %c0_i32 : i32
    %1 = arith.extui %0 : i1 to i32
    %c0_i32_0 = arith.constant 0 : i32
    %2 = arith.cmpi ne, %1, %c0_i32_0 : i32
    scf.if %2 {
      %cst_17 = arith.constant 0.000000e+00 : f32
      %45 = vector.broadcast %cst_17 : f32 to vector<4x3xf32>
      %c0_18 = arith.constant 0 : index
      %c0_19 = arith.constant 0 : index
      %c0_20 = arith.constant 0 : index
      %46 = vector.load %arg4[%c0_18, %c0_19, %c0_20] : memref<1x4x3xf32, #tpu.memory_space<vmem>>, vector<1x4x3xf32>
      %47 = vector.shape_cast %46 : vector<1x4x3xf32> to vector<4x3xf32>
      %48 = vector.shape_cast %45 : vector<4x3xf32> to vector<1x4x3xf32>
      tpu.vector_store %arg4[%c0_18, %c0_19, %c0_20], %48 {strides = array<i32>} : memref<1x4x3xf32, #tpu.memory_space<vmem>>, vector<1x4x3xf32>,
    } else {
    }
    %c0 = arith.constant 0 : index
    %c0_1 = arith.constant 0 : index
    %c0_2 = arith.constant 0 : index
    %3 = vector.load %arg2[%c0, %c0_1, %c0_2] : memref<1x4x256xf32, #tpu.memory_space<vmem>>, vector<1x4x256xf32>
    %4 = vector.shape_cast %3 : vector<1x4x256xf32> to vector<4x256xf32>
    %c0_3 = arith.constant 0 : index
    %c0_4 = arith.constant 0 : index
    %c0_5 = arith.constant 0 : index
    %5 = vector.load %arg3[%c0_3, %c0_4, %c0_5] : memref<1x1x256xi32, #tpu.memory_space<vmem>>, vector<1x1x256xi32>
    %6 = vector.shape_cast %5 : vector<1x1x256xi32> to vector<1x256xi32>
    %cst = arith.constant dense<0xFF800000> : vector<256xf32>
    %7 = vector.multi_reduction <maximumf>, %4, %cst [0] : vector<4x256xf32> to vector<256xf32>
    %8 = vector.shape_cast %7 : vector<256xf32> to vector<1x256xf32>
    %9 = vector.broadcast %8 : vector<1x256xf32> to vector<4x256xf32>
    %10 = arith.subf %4, %9 : vector<4x256xf32>
    %11 = math.exp %10 : vector<4x256xf32>
    %cst_6 = arith.constant dense<0.000000e+00> : vector<256xf32>
    %12 = vector.multi_reduction <add>, %11, %cst_6 [0] : vector<4x256xf32> to vector<256xf32>
    %13 = vector.shape_cast %12 : vector<256xf32> to vector<1x256xf32>
    %14 = math.log %13 : vector<1x256xf32>
    %15 = arith.addf %14, %8 : vector<1x256xf32>
    %16 = tpu.iota {dimensions = array<i32: 0>} : vector<4x256xi32>
    %17 = vector.broadcast %6 : vector<1x256xi32> to vector<4x256xi32>
    %18 = arith.cmpi eq, %16, %17 : vector<4x256xi32>
    %19 = arith.extui %18 : vector<4x256xi1> to vector<4x256xi32>
    %20 = arith.sitofp %19 : vector<4x256xi32> to vector<4x256xf32>
    %21 = arith.mulf %20, %4 : vector<4x256xf32>
    %cst_7 = arith.constant dense<0.000000e+00> : vector<256xf32>
    %22 = vector.multi_reduction <add>, %21, %cst_7 [0] : vector<4x256xf32> to vector<256xf32>
    %23 = vector.shape_cast %22 : vector<256xf32> to vector<1x256xf32>
    %24 = arith.subf %15, %23 : vector<1x256xf32>
    %25 = arith.cmpf olt, %23, %8 : vector<1x256xf32>
    %26 = arith.extui %25 : vector<1x256xi1> to vector<1x256xi32>
    %27 = arith.sitofp %26 : vector<1x256xi32> to vector<1x256xf32>
    %cst_8 = arith.constant dense<0.000000e+00> : vector<4xf32>
    %28 = vector.multi_reduction <add>, %20, %cst_8 [1] : vector<4x256xf32> to vector<4xf32>
    %29 = vector.shape_cast %28 : vector<4xf32> to vector<4x1xf32>
    %30 = vector.broadcast %27 : vector<1x256xf32> to vector<4x256xf32>
    %31 = arith.mulf %20, %30 : vector<4x256xf32>
    %cst_9 = arith.constant dense<0.000000e+00> : vector<4xf32>
    %32 = vector.multi_reduction <add>, %31, %cst_9 [1] : vector<4x256xf32> to vector<4xf32>
    %33 = vector.shape_cast %32 : vector<4xf32> to vector<4x1xf32>
    %34 = vector.broadcast %24 : vector<1x256xf32> to vector<4x256xf32>
    %35 = arith.mulf %20, %34 : vector<4x256xf32>
    %cst_10 = arith.constant dense<0.000000e+00> : vector<4xf32>
    %36 = vector.multi_reduction <add>, %35, %cst_10 [1] : vector<4x256xf32> to vector<4xf32>
    %37 = vector.shape_cast %36 : vector<4xf32> to vector<4x1xf32>
    %c0_11 = arith.constant 0 : index
    %c0_12 = arith.constant 0 : index
    %c0_13 = arith.constant 0 : index
    %38 = vector.load %arg4[%c0_11, %c0_12, %c0_13] : memref<1x4x3xf32, #tpu.memory_space<vmem>>, vector<1x4x3xf32>
    %39 = vector.shape_cast %38 : vector<1x4x3xf32> to vector<4x3xf32>
    %40 = tpu.concatenate %29, %33, %37 in 1 : vector<4x1xf32>, vector<4x1xf32>, vector<4x1xf32> -> vector<4x3xf32>
    %41 = arith.addf %39, %40 : vector<4x3xf32>
    %c0_14 = arith.constant 0 : index
    %c0_15 = arith.constant 0 : index
    %c0_16 = arith.constant 0 : index
    %42 = vector.load %arg4[%c0_14, %c0_15, %c0_16] : memref<1x4x3xf32, #tpu.memory_space<vmem>>, vector<1x4x3xf32>
    %43 = vector.shape_cast %42 : vector<1x4x3xf32> to vector<4x3xf32>
    %44 = vector.shape_cast %41 : vector<4x3xf32> to vector<1x4x3xf32>
    tpu.vector_store %arg4[%c0_14, %c0_15, %c0_16], %44 {strides = array<i32>} : memref<1x4x3xf32, #tpu.memory_space<vmem>>, vector<1x4x3xf32>,
    return
  }
  func.func @transform_0(%arg0: i32, %arg1: i32) -> (i32, i32, i32) {
    %c0_i32 = arith.constant 0 : i32
    %c0_i32_0 = arith.constant 0 : i32
    return %arg0, %c0_i32, %arg1 : i32, i32, i32
  }
  func.func @transform_1(%arg0: i32, %arg1: i32) -> (i32, i32, i32) {
    %c0_i32 = arith.constant 0 : i32
    %c0_i32_0 = arith.constant 0 : i32
    return %arg0, %c0_i32, %arg1 : i32, i32, i32
  }
  func.func @transform_2(%arg0: i32, %arg1: i32) -> (i32, i32, i32) {
    %c0_i32 = arith.constant 0 : i32
    %c0_i32_0 = arith.constant 0 : i32
    %c0_i32_1 = arith.constant 0 : i32
    return %arg0, %c0_i32, %c0_i32_0 : i32, i32, i32
  }
}

</mosaic_0001>

<bundles_post_ra>
// kernel: recall_cross_entropy.1
= control target key start
LH: loop header
LB: loop body
LE: loop exit
PB: predicated region body
PF: predicated region fallthrough
CT: control target
= control target key end

     0   :  { %s496_s9 = smov 0   ;;  %s498_s10 = smov 0   ;;  %s568_s0 = inlined_call_operand.vmem [shape: f32[2,4,256], index: 0, kind: input, shape index: {}]   ;;  %s569_s1 = inlined_call_operand.vmem [shape: s32[2,1,256], index: 1, kind: input, shape index: {}]   ;;  %s570_s2 = inlined_call_operand.vmem [shape: f32[2,4,3], index: 2, kind: output, shape index: {}]  }
   0x1   :  { %s500_s11 = smov 0  }
   0x2 LB: > { %s24_s12 = sadd.s32 1, %s474_s10  ;;  %p412_p0 = scmp.ge.s32.totalorder %s478_s11, 1  ;;  %s478_s11 = sphi %s500_s11, %s12_s11   ;;  %s474_s10 = sphi %s498_s10, %s572_s10   ;;  %s470_s9 = sphi %s496_s9, %s571_s9  }
   0x3   : > { %p26_p1 = scmp.ge.s32.totalorder %s24_s12, 2  ;;  %p147_p2 = scmp.lt.s32.totalorder %s478_s11, 3 }
   0x5   : > { %s574_s12 = smov (%p26_p1, %s24_s12), 0  ;;  %p148_p3 = pnand %p412_p0, %p147_p2 }
   0x6   : > { %p181_p4 = scmp.lt.s32.totalorder (!%p148_p3), %s470_s9, 1  ;;  %v259_v0 = vlaneseq (!%p148_p3)  ;;  %vm214_vm0 = vcmask (!%p148_p3), 1043456   ;;  %v480_v12 = vmov (!%p148_p3), 0.0   ;;  %vm207_vm5 = vcmask (!%p148_p3), 19456  }
   0x7   : > { %151 = sbr.rel (%p148_p3) target bundleno = 234 (0xea), region = 28  ;;  %vm319_vm6 = vcmask (!%p148_p3), 7168   ;;  %vm321_vm7 = vcmask (!%p148_p3), 15360  }
   0x8   : > { %v260_v1 = vshrl.u32 (!%p148_p3), %v259_v0, 7 }
   0xa   : > { %v263_v2 = vsub.s32 (!%p148_p3), 0, %v260_v1  ;;  %v267_v3 = vsub.s32 (!%p148_p3), 1, %v260_v1 }
   0xe   : > { %s576_s9 = smov (!%p181_p4, %s470_s9), 1 }
   0xf   : > { %s415_s13 = sshll.u32 %s576_s9, 1  ;;  %s423_s14 = sshll.u32 %s576_s9, 3 }
  0x10   : > { %s197_s17 = scalar_lea.vmem %s569_s1, %s415_s13  ;;  %s188_s20 = scalar_lea.vmem %s568_s0, %s423_s14 }
  0x11   : > { %v210_v4 = vld [vmem:[%s197_s17] sm:$0x3]  ;;  %s416_s21 = sshll.u32 %s576_s9, 2 }
  0x12   : > { %v209_v5 = vld [vmem:[%s188_s20] sm:$0xff]  ;;  %v264_v6 = vrot.slane %v210_v4, %v263_v2  ;;  %v268_v7 = vrot.slane %v210_v4, %v267_v3  ;;  %s202_s24 = scalar_lea.vmem %s570_s2, %s416_s21 }
  0x13   : > { %v212_v8 = vcombine.high %v209_v5, %v209_v5  ;;  %v215_v9 = vsel %vm214_vm0, %v209_v5, -inf  ;;  %208 = vst.msk [vmem:[%s202_s24] sm:$0xf] %vm207_vm5, %v480_v12 }
  0x14   : > { %v216_v10 = vrot.slane %v215_v9, 4  ;;  %vm269_vm1 = vcmp.eq.s32.totalorder %v260_v1, %v264_v6  ;;  %vm270_vm2 = vcmp.eq.s32.totalorder %v260_v1, %v268_v7 }
  0x15   : > { %v222_v11 = vsel %vm214_vm0, %v212_v8, -inf  ;;  %v527_v13 = vsel %vm269_vm1, 1.0, %v480_v12  ;;  %v530_v14 = vsel %vm270_vm2, 1.0, %v480_v12 }
  0x16   : > { %v223_v15 = vrot.slane %v222_v11, 4  ;;  %v217_v16 = vmax.f32 %v215_v9, %v216_v10  ;;  %v299_v17 = vsel %vm214_vm0, %v527_v13, 0.0  ;;  %v300_v18 = vsel %vm214_vm0, %v530_v14, 0.0 }
  0x17   : > { %v275_v19 = vmul.f32 %v527_v13, %v209_v5  ;;  %v276_v20 = vmul.f32 %v530_v14, %v212_v8  ;;  %v301_v21 = vadd.f32 %v300_v18, %v299_v17 }
  0x18   : > { %v224_v22 = vmax.f32 %v222_v11, %v223_v15  ;;  %v218_v23 = vrot.slane %v217_v16, 2 }
  0x19   : > { %v277_v24 = vsel %vm214_vm0, %v275_v19, 0.0  ;;  %v284_v25 = vsel %vm214_vm0, %v276_v20, 0.0  ;;  %302 = vadd.xlane.f32.xlu0 %v301_v21 }
  0x1a   : > { %v278_v26 = vrot.slane %v277_v24, 4  ;;  %v285_v27 = vrot.slane %v284_v25, 4  ;;  %v219_v28 = vmax.f32 %v217_v16, %v218_v23  ;;  %v225_v29 = vrot.slane %v224_v22, 2 }
  0x1c   : > { %v279_v30 = vadd.f32 %v278_v26, %v277_v24  ;;  %v286_v31 = vadd.f32 %v285_v27, %v284_v25  ;;  %v220_v32 = vrot.slane %v219_v28, 1  ;;  %v226_v33 = vmax.f32 %v224_v22, %v225_v29  ;;  %v318_v24 = vld [vmem:[%s202_s24] sm:$0xf] }
  0x1e   : > { %v221_v34 = vmax.f32 %v219_v28, %v220_v32  ;;  %v227_v35 = vrot.slane %v226_v33, 1  ;;  %v280_v36 = vrot.slane %v279_v30, 2  ;;  %v287_v37 = vrot.slane %v286_v31, 2 }
  0x20   : > { %v228_v38 = vmax.f32 %v226_v33, %v227_v35  ;;  %v281_v39 = vadd.f32 %v280_v36, %v279_v30  ;;  %v288_v40 = vadd.f32 %v287_v37, %v286_v31 }
  0x22   : > { %v282_v41 = vrot.slane %v281_v39, 1  ;;  %v289_v42 = vrot.slane %v288_v40, 1  ;;  %v231_v43 = vcombine.low %v221_v34, %v228_v38 }
  0x24   : > { %v283_v44 = vadd.f32 %v282_v41, %v281_v39  ;;  %v290_v45 = vadd.f32 %v289_v42, %v288_v40  ;;  %v233_v46 = vsub.f32 %v209_v5, %v231_v43 }
  0x26   : > { %vm293_vm3 = vcmp.lt.f32.partialorder %v283_v44, %v221_v34  ;;  %vm294_vm4 = vcmp.lt.f32.partialorder %v290_v45, %v228_v38  ;;  %v234_v47 = vmul.f32 1.442695, %v233_v46 }
  0x27   : > { %v419_v48 = vsel %vm293_vm3, 1.0, %v480_v12  ;;  %v420_v49 = vsel %vm294_vm4, 1.0, %v480_v12 }
  0x28   : > { %v304_v50 = vmul.f32 %v419_v48, %v527_v13  ;;  %v305_v51 = vmul.f32 %v420_v49, %v530_v14  ;;  %450 = vpow2.f32 %v234_v47 }
  0x2a   : > { %v306_v52 = vsel %vm214_vm0, %v304_v50, 0.0  ;;  %v307_v53 = vsel %vm214_vm0, %v305_v51, 0.0 }
  0x2b   : > { %v308_v54 = vadd.f32 %v307_v53, %v306_v52 }
  0x2d   : > { %309 = vadd.xlane.f32.xlu0 %v308_v54 }
  0x32   : > { %v451_v55 = vpop.eup %450 }
  0x33   : > { %v237_v56 = vcombine.high %v451_v55, %v451_v55  ;;  %v239_v57 = vsel %vm214_vm0, %v451_v55, 0.0 }
  0x34   : > { %v240_v58 = vrot.slane %v239_v57, 4 }
  0x35   : > { %v246_v59 = vsel %vm214_vm0, %v237_v56, 0.0 }
  0x36   : > { %v241_v60 = vadd.f32 %v240_v58, %v239_v57  ;;  %v247_v61 = vrot.slane %v246_v59, 4 }
  0x38   : > { %v242_v62 = vrot.slane %v241_v60, 2  ;;  %v248_v63 = vadd.f32 %v247_v61, %v246_v59 }
  0x3a   : > { %v243_v0 = vadd.f32 %v242_v62, %v241_v60  ;;  %v249_v1 = vrot.slane %v248_v63, 2 }
  0x3c   : > { %v244_v2 = vrot.slane %v243_v0, 1  ;;  %v250_v3 = vadd.f32 %v249_v1, %v248_v63 }
  0x3e   : > { %v245_v4 = vadd.f32 %v244_v2, %v243_v0  ;;  %v251_v5 = vrot.slane %v250_v3, 1 }
  0x40   : > { %v252_v6 = vadd.f32 %v251_v5, %v250_v3  ;;  %452 = vlog2.f32 %v245_v4 }
  0x42   : > { %454 = vlog2.f32 %v252_v6 }
  0x4a   : > { %v453_v7 = vpop.eup %452 }
  0x4b   : > { %v254_v8 = vmul.f32 0.6931472, %v453_v7 }
  0x4c   : > { %v455_v9 = vpop.eup %454 }
  0x4d   : > { %v256_v10 = vmul.f32 0.6931472, %v455_v9  ;;  %v257_v11 = vadd.f32 %v254_v8, %v221_v34 }
  0x4f   : > { %v258_v15 = vadd.f32 %v256_v10, %v228_v38  ;;  %v291_v16 = vsub.f32 %v257_v11, %v283_v44 }
  0x51   : > { %v292_v17 = vsub.f32 %v258_v15, %v290_v45  ;;  %v311_v18 = vmul.f32 %v527_v13, %v291_v16 }
  0x53   : > { %v312_v19 = vmul.f32 %v530_v14, %v292_v17  ;;  %v313_v20 = vsel %vm214_vm0, %v311_v18, 0.0 }
  0x55   : > { %v314_v12 = vsel %vm214_vm0, %v312_v19, 0.0 }
  0x56   : > { %v315_v21 = vadd.f32 %v314_v12, %v313_v20 }
  0x58   : > { %316 = vadd.xlane.f32.xlu1 %v315_v21 }
  0xa6   : > { %v303_v22 = vpop.xlane.xlu0 %302 }
  0xba   : > { %v310_v23 = vpop.xlane.xlu0 %309 }
  0xbb   : > { %v320_v25 = vsel %vm319_vm6, %v303_v22, %v310_v23 }
  0xe5   : > { %v317_v26 = vpop.xlane.xlu1 %316 }
  0xe6   : > { %v322_v27 = vsel %vm321_vm7, %v320_v25, %v317_v26 }
  0xe7   : > { %v323_v28 = vadd.f32 %v322_v27, %v318_v24 }
  0xe9   : > { %325 = vst.msk [vmem:[%s202_s24] sm:$0xf] %vm207_vm5, %v323_v28 }
  0xea PF: > { %s12_s11 = sadd.s32 1, %s478_s11   ;;  %s571_s9 = smov %s474_s10 }
  0xeb   : > { %p9_p5 = scmp.ge.s32.totalorder %s12_s11, 4   ;;  %s572_s10 = smov %s574_s12 }
  0xed   :  { %11 = sbr.rel (!%p9_p5) target bundleno = 2 (0x2), region = 65 }

</bundles_post_ra>
